<compile_context>
chip_gen: v6e
topology: v6e:2x2x1
jax: 0.10.0
libtpu: 0.0.40
codegen_flags: <defaults>
</compile_context>

<pallas_src>
import jax
import jax.numpy as jnp
import numpy as np
from jax.experimental import pallas as pl
from jax.experimental.pallas import tpu as pltpu


# ----------------------------------------------------------------------------
# Kernel: fused row-wise dot product (== diagonal of U @ I.T)
# ----------------------------------------------------------------------------
def _rowdot_kernel(ue_ref, ie_ref, o_ref):
    # ue_ref / ie_ref: (F, TB) -- factors on sublanes, batch rows on lanes.
    # o_ref:           (1, TB) -- lane-dense f32 scores.
    u = ue_ref[...].astype(jnp.float32)
    i = ie_ref[...].astype(jnp.float32)
    o_ref[...] = jnp.sum(u * i, axis=0, keepdims=True)


def _round_up(x, m):
    return -(-x // m) * m


def _choose_tiles(num_factors, batch, itemsize, block_rows=None,
                  *, target_block_bytes=4 << 20, min_tiles=4):
    """Pick (tile_batch, padded_batch).

    tile_batch is a multiple of 128 unless a single full-extent block covers
    the whole (unpadded) batch.
    """
    if block_rows is None:
        # ~4 MiB per input block so each grid step's DMA dwarfs the ~0.35 us
        # fixed per-step overhead (step-overhead-bound at small F otherwise).
        tb = max(128, (target_block_bytes // (num_factors * itemsize)) // 128 * 128)
        # v7x megacore: keep >= min_tiles grid steps so "parallel" can shard
        # the batch tiles across both TensorCores.
        if batch > 128 * min_tiles:
            tb = min(tb, _round_up(-(-batch // min_tiles), 128))
    else:
        # Enforce the (8,128) lane alignment internally instead of relying on
        # the caller; also keeps the (1, TB) output store unmasked.
        tb = max(128, _round_up(int(block_rows), 128))
    if batch <= tb:
        return batch, batch          # single block, full-array dims (no pad)
    return tb, _round_up(batch, tb)


def rowwise_dot(ue_t, ie_t, tb):
    """out[b] = sum_f ue_t[f, b] * ie_t[f, b]. Inputs (F, BP), BP % tb == 0."""
    F, BP = ue_t.shape
    grid = (BP // tb,)
    block_bytes = F * tb * ue_t.dtype.itemsize
    # 2 inputs x double buffering + double-buffered (1, tb) f32 output + slack;
    # capped at 48 MiB so it is safe on v7x's 64 MiB physical VMEM.
    vmem_limit = int(min(48 * 1024 * 1024,
                         max(16 * 1024 * 1024,
                             4 * block_bytes + 8 * tb + (4 << 20))))

    out = pl.pallas_call(
        _rowdot_kernel,
        out_shape=jax.ShapeDtypeStruct((1, BP), jnp.float32),
        grid_spec=pltpu.PrefetchScalarGridSpec(
            num_scalar_prefetch=0,
            grid=grid,
            in_specs=[
                pl.BlockSpec((F, tb), lambda i: (0, i)),
                pl.BlockSpec((F, tb), lambda i: (0, i)),
            ],
            out_specs=pl.BlockSpec((1, tb), lambda i: (0, i)),
        ),
        compiler_params=pltpu.CompilerParams(
            dimension_semantics=("parallel",),     # shard batch tiles across TCs
            vmem_limit_bytes=vmem_limit,
        ),
    )(ue_t, ie_t)
    return out[0]


# ----------------------------------------------------------------------------
# Parameters (nn.Embedding default init: N(0, 1)), stored TRANSPOSED (F, N)
# so the gather produces (F, B) directly -- no per-call transpose HBM pass.
# ----------------------------------------------------------------------------
def init_params(key, num_users, num_items, num_factors, dtype=jnp.float32):
    ku, ki = jax.random.split(key)
    return dict(
        user_factors_t=jax.random.normal(
            ku, (num_factors, num_users), jnp.float32).astype(dtype),
        item_factors_t=jax.random.normal(
            ki, (num_factors, num_items), jnp.float32).astype(dtype),
    )


def matrix_factorization_forward(params, users, items, *, block_rows=None):
    uf_t = params["user_factors_t"]          # (F, num_users)
    if_t = params["item_factors_t"]          # (F, num_items)
    F = uf_t.shape[0]
    B = users.shape[0]
    tb, bp = _choose_tiles(F, B, uf_t.dtype.itemsize, block_rows)
    if bp != B:
        # Pad the cheap int32 index vectors (index 0 is always valid); the
        # padded lanes are computed and sliced off below. Never pad the floats.
        users = jnp.pad(users, (0, bp - B))
        items = jnp.pad(items, (0, bp - B))
    # Embedding lookup == XLA gather, straight into (F, bp) layout: batch on
    # lanes, factors on sublanes, no transpose pass.
    ue_t = jnp.take(uf_t, users, axis=1)
    ie_t = jnp.take(if_t, items, axis=1)
    # TODO(synk): when the factor tables fit VMEM, fuse this gather into the
    # kernel (scalar-prefetched indices + VMEM-resident tables) to drop the
    # gather's HBM writeback and the kernel's re-read of it entirely.
    return rowwise_dot(ue_t, ie_t, tb)[:B]


# ----------------------------------------------------------------------------
# Pure-JAX reference: literal translation of the PyTorch forward
# ----------------------------------------------------------------------------
def reference_forward(params, users, items):
    u = params["user_factors_t"].T[users].astype(jnp.float32)
    it = params["item_factors_t"].T[items].astype(jnp.float32)
    return jnp.diagonal(u @ it.T)


if __name__ == "__main__":
    NUM_USERS, NUM_ITEMS, NUM_FACTORS = 10, 12, 16

    key = jax.random.PRNGKey(0)
    k_params, k_u, k_i, k_u2, k_i2 = jax.random.split(key, 5)
    params = init_params(k_params, NUM_USERS, NUM_ITEMS, NUM_FACTORS)

    # Small batch: single full-extent block path.
    B = 8
    users = jax.random.randint(k_u, (B,), 0, NUM_USERS, jnp.int32)
    items = jax.random.randint(k_i, (B,), 0, NUM_ITEMS, jnp.int32)
    out = jax.block_until_ready(matrix_factorization_forward(params, users, items))
    ref = jax.block_until_ready(reference_forward(params, users, items))
    np.testing.assert_allclose(np.asarray(out), np.asarray(ref), rtol=1e-5, atol=1e-5)

    # Larger batch with an explicit small tile: exercises index padding +
    # multi-tile grid (bp = 384, grid = 3).
    B2 = 300
    users2 = jax.random.randint(k_u2, (B2,), 0, NUM_USERS, jnp.int32)
    items2 = jax.random.randint(k_i2, (B2,), 0, NUM_ITEMS, jnp.int32)
    out2 = jax.block_until_ready(
        matrix_factorization_forward(params, users2, items2, block_rows=128))
    ref2 = jax.block_until_ready(reference_forward(params, users2, items2))
    np.testing.assert_allclose(np.asarray(out2), np.asarray(ref2), rtol=1e-5, atol=1e-5)

    # Optional bf16 table storage (halves HBM bytes; kernel accumulates in f32).
    params_bf16 = jax.tree_util.tree_map(lambda x: x.astype(jnp.bfloat16), params)
    out3 = jax.block_until_ready(
        matrix_factorization_forward(params_bf16, users2, items2, block_rows=128))
    ref3 = jax.block_until_ready(reference_forward(params_bf16, users2, items2))
    np.testing.assert_allclose(np.asarray(out3), np.asarray(ref3), rtol=1e-3, atol=1e-3)

    print("KERNEL_OK")
</pallas_src>

<mosaic_0001>
module attributes {stable_mosaic.version = 11 : i64} {
  func.func @_rowdot_kernel(%arg0: i32, %arg1: memref<16x8xf32, #tpu.memory_space<vmem>>, %arg2: memref<16x8xf32, #tpu.memory_space<vmem>>, %arg3: memref<1x8xf32, #tpu.memory_space<vmem>>) attributes {dimension_semantics = [#tpu.dimension_semantics<parallel>], iteration_bounds = array<i64: 1>, scalar_prefetch = 0 : i64, scratch_operands = 0 : i64, tpu.core_type = #tpu.core_type<tc>, window_params = [{transform_indices = @transform_0, window_bounds = array<i64: 16, 8>}, {transform_indices = @transform_1, window_bounds = array<i64: 16, 8>}, {transform_indices = @transform_2, window_bounds = array<i64: 1, 8>}]} {
    %c0 = arith.constant 0 : index
    %c0_0 = arith.constant 0 : index
    %0 = vector.load %arg1[%c0, %c0_0] : memref<16x8xf32, #tpu.memory_space<vmem>>, vector<16x8xf32>
    %c0_1 = arith.constant 0 : index
    %c0_2 = arith.constant 0 : index
    %1 = vector.load %arg2[%c0_1, %c0_2] : memref<16x8xf32, #tpu.memory_space<vmem>>, vector<16x8xf32>
    %2 = arith.mulf %0, %1 : vector<16x8xf32>
    %cst = arith.constant dense<0.000000e+00> : vector<8xf32>
    %3 = vector.multi_reduction <add>, %2, %cst [0] : vector<16x8xf32> to vector<8xf32>
    %4 = vector.shape_cast %3 : vector<8xf32> to vector<1x8xf32>
    %c0_3 = arith.constant 0 : index
    %c0_4 = arith.constant 0 : index
    %5 = vector.load %arg3[%c0_3, %c0_4] : memref<1x8xf32, #tpu.memory_space<vmem>>, vector<1x8xf32>
    tpu.vector_store %arg3[%c0_3, %c0_4], %4 {strides = array<i32>} : memref<1x8xf32, #tpu.memory_space<vmem>>, vector<1x8xf32>,
    return
  }
  func.func @transform_0(%arg0: i32) -> (i32, i32) {
    %c0_i32 = arith.constant 0 : i32
    %c0_i32_0 = arith.constant 0 : i32
    return %c0_i32, %arg0 : i32, i32
  }
  func.func @transform_1(%arg0: i32) -> (i32, i32) {
    %c0_i32 = arith.constant 0 : i32
    %c0_i32_0 = arith.constant 0 : i32
    return %c0_i32, %arg0 : i32, i32
  }
  func.func @transform_2(%arg0: i32) -> (i32, i32) {
    %c0_i32 = arith.constant 0 : i32
    %c0_i32_0 = arith.constant 0 : i32
    return %c0_i32, %arg0 : i32, i32
  }
}

</mosaic_0001>

<bundles_post_ra>
// kernel: tpu_custom_call.1
= control target key start
LH: loop header
LB: loop body
LE: loop exit
PB: predicated region body
PF: predicated region fallthrough
CT: control target
= control target key end

     0   :  { %vm18_vm0 = vcmask 64512   ;;  %s98_s0 = inlined_call_operand.vmem [shape: f32[16,8], index: 0, kind: input, shape index: {}]   ;;  %s99_s1 = inlined_call_operand.vmem [shape: f32[16,8], index: 1, kind: input, shape index: {}]   ;;  %s100_s2 = inlined_call_operand.hbm [shape: f32[1,8], index: 2, kind: output, shape index: {}]  }
   0x1   :  { %v12_v0 = vld [vmem:[%s98_s0] sm:$0xff]  ;;  %v13_v1 = vld [vmem:[%s98_s0 + $0x8] sm:$0xff] }
   0x2   :  { %v14_v2 = vld [vmem:[%s99_s1] sm:$0xff]  ;;  %v15_v3 = vld [vmem:[%s99_s1 + $0x8] sm:$0xff] }
   0x3   :  { %v16_v4 = vmul.f32 %v14_v2, %v12_v0 }
   0x4   :  { %7 = vsyncpa [#allocation3], 0  ;;  %v17_v5 = vmul.f32 %v15_v3, %v13_v1  ;;  %s67_s0 = smov [#allocation2]   ;;  %vm28_vm1 = vcmask 57344  }
   0x5   :  { %v19_v6 = vsel %vm18_vm0, %v16_v4, 0.0  ;;  %s36_s17 = sshll.u32 %s67_s0, 4  ;;  %s37_s17 = int_to_ptr.vmem [resolvable:$true] %s36_s17 }
   0x6   :  { %v20_v7 = vsel %vm18_vm0, %v17_v5, 0.0  ;;  %s45_s18 = scalar_lea.vmem %s37_s17, 16  ;;  %s49_s1 = scalar_lea.vmem %s37_s17, 32 }
   0x7   :  { %v21_v8 = vadd.f32 %v20_v7, %v19_v6  ;;  %p46_p0 = scmp.ne.s32.totalorder %s37_s17, %s45_s18  ;;  %p50_p1 = scmp.lt.s32.totalorder %s37_s17, %s37_s17 }
   0x8   :  { %p51_p2 = scmp.lt.s32.totalorder %s49_s1, %s45_s18 }
   0x9   :  { %v22_v9 = vrot.slane %v21_v8, 4 }
   0xa   :  { %p52_p3 = por %p51_p2, %p50_p1 }
   0xb   :  { %v23_v10 = vadd.f32 %v22_v9, %v21_v8 }
   0xc   :  { %p53_p4 = pnand %p52_p3, %p46_p0 }
   0xd   :  { %v24_v11 = vrot.slane %v23_v10, 2 }
   0xf   :  { %v25_v12 = vadd.f32 %v24_v11, %v23_v10 }
  0x11   :  { %v26_v13 = vrot.slane %v25_v12, 1 }
  0x13   :  { %v27_v14 = vadd.f32 %v26_v13, %v25_v12 }
  0x15   :  { %29 = vst.msk [vmem:[#allocation2] sm:$0x1] %vm28_vm1, %v27_v14 }
  0x16   :  { %56 = shalt.err (!%p53_p4)
}
  0x17   :  { %39 = dma.vmem_to_hbm [thread:$0]  %s37_s17, 16, %s100_s2, [#allocation3]  }
  0x18   :  { %65 = dma.done.wait [#allocation3], 16  }
  0x19   :  { %66 = vsyncadd [#allocation3], 4294967280 }
  0x1a   :  { %43 = vsyncpa [#allocation3], 1 }

</bundles_post_ra>
